<compile_context>
chip_gen: v7x
topology: tpu7x:2x2x1
jax: 0.10.0
libtpu: 0.0.40
codegen_flags: <defaults>
</compile_context>

<pallas_src>
import functools
import math

import jax
import jax.numpy as jnp
from jax.experimental import pallas as pl
from jax.experimental.pallas import tpu as pltpu


def _attention_kernel(q_ref, k_ref, v_ref,
                      wq_ref, bq_ref,
                      wk_ref, bk_ref,
                      wv_ref, bv_ref,
                      wo_ref, bo_ref,
                      o_ref,
                      q_scr, m_scr, l_scr, acc_scr,
                      *, scale, use_bf16):
    ki = pl.program_id(2)
    nk = pl.num_programs(2)

    @pl.when(ki == 0)
    def _init():
        # Q projection once per q-tile; fold 1/sqrt(E) into Q here (cheaper
        # than scaling the (tq, tk) score matrix every kv step).
        q = q_ref[0]                                               # (tq, Ep)
        Q = jnp.dot(q, wq_ref[...], preferred_element_type=jnp.float32)
        q_scr[...] = (Q + bq_ref[...]) * scale
        m_scr[...] = jnp.full_like(m_scr, -jnp.inf)
        l_scr[...] = jnp.zeros_like(l_scr)
        acc_scr[...] = jnp.zeros_like(acc_scr)

    # K / V projections for this kv tile.
    k = k_ref[0]                                                   # (tk, Ep)
    v = v_ref[0]                                                   # (tk, Ep)
    K = jnp.dot(k, wk_ref[...], preferred_element_type=jnp.float32) + bk_ref[...]
    V = jnp.dot(v, wv_ref[...], preferred_element_type=jnp.float32) + bv_ref[...]

    Q = q_scr[...]
    if use_bf16:
        Qm, Km = Q.astype(jnp.bfloat16), K.astype(jnp.bfloat16)
    else:
        Qm, Km = Q, K

    # Scores (tq, tk): contraction on the last dim of both operands, so no
    # explicit K transpose (MXU-native "NT" matmul).
    s = jax.lax.dot_general(Qm, Km, (((1,), (1,)), ((), ())),
                            preferred_element_type=jnp.float32)

    # TODO(synk): the PyTorch mask path calls the nonexistent `mask_fill`
    # (would raise); only the mask=None path is implemented here.

    # Online softmax update.
    m_prev = m_scr[...]
    m_new = jnp.maximum(m_prev, jnp.max(s, axis=-1, keepdims=True))
    alpha = jnp.exp(m_prev - m_new)
    p = jnp.exp(s - m_new)
    l_scr[...] = alpha * l_scr[...] + jnp.sum(p, axis=-1, keepdims=True)
    if use_bf16:
        pv = jnp.dot(p.astype(jnp.bfloat16), V.astype(jnp.bfloat16),
                     preferred_element_type=jnp.float32)
    else:
        pv = jnp.dot(p, V, preferred_element_type=jnp.float32)
    acc_scr[...] = alpha * acc_scr[...] + pv
    m_scr[...] = m_new

    @pl.when(ki == nk - 1)
    def _finalize():
        # Normalize the O(tq*E) accumulator (not the O(tq*tk) p matrix).
        inv_l = pl.reciprocal(l_scr[...], approx=False)
        out = acc_scr[...] * inv_l                                 # (tq, Ep)
        # Output projection + bias, applied once per q-tile.
        out = jnp.dot(out, wo_ref[...], preferred_element_type=jnp.float32)
        out = out + bo_ref[...]
        o_ref[0] = out.astype(o_ref.dtype)


def _pick_tile(seq_len, target=128):
    """Largest multiple-of-8 divisor of seq_len not exceeding `target`."""
    if seq_len <= target:
        return seq_len
    t = (target // 8) * 8
    while t >= 8:
        if seq_len % t == 0:
            return t
        t -= 8
    return seq_len  # fallback: one tile covering the full sequence


def attention_pallas(queries, keys, values, params, *, use_bf16=False,
                     tq=None, tk=None):
    """queries/keys/values: [B, S, E] float32.  params: dict of weights
    stored as (in_features, out_features) plus (1, E) biases."""
    B, S, E = queries.shape
    scale = 1.0 / math.sqrt(E)

    # Lane-dense padding of the embedding dim (zero padding is a no-op for
    # the math: padded weight rows/cols and biases are zero).
    Ep = ((E + 127) // 128) * 128

    def pad_act(x):
        return x if E == Ep else jnp.pad(x, ((0, 0), (0, 0), (0, Ep - E)))

    def pad_w(w):
        return w if E == Ep else jnp.pad(w, ((0, Ep - E), (0, Ep - E)))

    def pad_b(b):
        return b if E == Ep else jnp.pad(b, ((0, 0), (0, Ep - E)))

    qp = pad_act(queries)
    kp = pad_act(keys)
    vp = pad_act(values)

    if tq is None:
        tq = _pick_tile(S)
    if tk is None:
        tk = _pick_tile(S)

    grid = (B, S // tq, S // tk)

    act_q_spec = pl.BlockSpec((1, tq, Ep), lambda b, qi, ki: (b, qi, 0))
    act_kv_spec = pl.BlockSpec((1, tk, Ep), lambda b, qi, ki: (b, ki, 0))
    w_spec = pl.BlockSpec((Ep, Ep), lambda b, qi, ki: (0, 0))
    b_spec = pl.BlockSpec((1, Ep), lambda b, qi, ki: (0, 0))
    out_spec = pl.BlockSpec((1, tq, Ep), lambda b, qi, ki: (b, qi, 0))

    kernel = functools.partial(_attention_kernel, scale=scale,
                               use_bf16=use_bf16)

    out_padded = pl.pallas_call(
        kernel,
        out_shape=jax.ShapeDtypeStruct((B, S, Ep), queries.dtype),
        grid_spec=pltpu.PrefetchScalarGridSpec(
            num_scalar_prefetch=0,
            grid=grid,
            in_specs=[
                act_q_spec, act_kv_spec, act_kv_spec,   # queries, keys, values
                w_spec, b_spec,                          # query proj
                w_spec, b_spec,                          # key proj
                w_spec, b_spec,                          # value proj
                w_spec, b_spec,                          # fc_out
            ],
            out_specs=out_spec,
            scratch_shapes=[
                pltpu.VMEM((tq, Ep), jnp.float32),   # cached scaled Q tile
                pltpu.VMEM((tq, 1), jnp.float32),    # running max m
                pltpu.VMEM((tq, 1), jnp.float32),    # running denom l
                pltpu.VMEM((tq, Ep), jnp.float32),   # output accumulator
            ],
        ),
        compiler_params=pltpu.CompilerParams(
            dimension_semantics=("parallel", "parallel", "arbitrary")),
    )(qp, kp, vp,
      pad_w(params["wq"]), pad_b(params["bq"]),
      pad_w(params["wk"]), pad_b(params["bk"]),
      pad_w(params["wv"]), pad_b(params["bv"]),
      pad_w(params["wo"]), pad_b(params["bo"]))

    if E == Ep:
        return out_padded
    return out_padded[..., :E]


def init_params(key, embed_dim):
    """Deterministic nn.Linear-style init.  Weights stored as (in, out)."""
    bound = 1.0 / math.sqrt(embed_dim)
    ks = jax.random.split(key, 8)

    def lin(kw, kb):
        w = jax.random.uniform(kw, (embed_dim, embed_dim), jnp.float32,
                               minval=-bound, maxval=bound)
        b = jax.random.uniform(kb, (1, embed_dim), jnp.float32,
                               minval=-bound, maxval=bound)
        return w, b

    wq, bq = lin(ks[0], ks[1])
    wk, bk = lin(ks[2], ks[3])
    wv, bv = lin(ks[4], ks[5])
    wo, bo = lin(ks[6], ks[7])
    return dict(wq=wq, bq=bq, wk=wk, bk=bk, wv=wv, bv=bv, wo=wo, bo=bo)


def attention_ref(queries, keys, values, params):
    """Pure-JAX reference matching the PyTorch forward (mask=None)."""
    E = queries.shape[-1]
    Q = queries @ params["wq"] + params["bq"]
    K = keys @ params["wk"] + params["bk"]
    V = values @ params["wv"] + params["bv"]
    energy = jnp.einsum("bqe,bke->bqk", Q, K) / math.sqrt(E)
    attn = jax.nn.softmax(energy, axis=-1)
    out = jnp.einsum("bqk,bke->bqe", attn, V)
    return out @ params["wo"] + params["bo"]


if __name__ == "__main__":
    B, S, E = 2, 8, 32
    key = jax.random.PRNGKey(0)
    kq, kk, kv, kp = jax.random.split(key, 4)

    queries = jax.random.normal(kq, (B, S, E), jnp.float32)
    keys_in = jax.random.normal(kk, (B, S, E), jnp.float32)
    values = jax.random.normal(kv, (B, S, E), jnp.float32)
    params = init_params(kp, E)

    out = attention_pallas(queries, keys_in, values, params)
    out = jax.block_until_ready(out)

    ref = attention_ref(queries, keys_in, values, params)
    assert out.shape == (B, S, E)
    assert jnp.allclose(out, ref, atol=1e-4, rtol=1e-4), "mismatch vs reference"

    print("KERNEL_OK")
</pallas_src>

<mosaic_0001>
module attributes {stable_mosaic.version = 11 : i64} {
  func.func @_attention_kernel(%arg0: i32, %arg1: i32, %arg2: i32, %arg3: memref<1x8x128xf32, #tpu.memory_space<vmem>>, %arg4: memref<1x8x128xf32, #tpu.memory_space<vmem>>, %arg5: memref<1x8x128xf32, #tpu.memory_space<vmem>>, %arg6: memref<128x128xf32, #tpu.memory_space<vmem>>, %arg7: memref<1x128xf32, #tpu.memory_space<vmem>>, %arg8: memref<128x128xf32, #tpu.memory_space<vmem>>, %arg9: memref<1x128xf32, #tpu.memory_space<vmem>>, %arg10: memref<128x128xf32, #tpu.memory_space<vmem>>, %arg11: memref<1x128xf32, #tpu.memory_space<vmem>>, %arg12: memref<128x128xf32, #tpu.memory_space<vmem>>, %arg13: memref<1x128xf32, #tpu.memory_space<vmem>>, %arg14: memref<1x8x128xf32, #tpu.memory_space<vmem>>, %arg15: memref<8x128xf32, #tpu.memory_space<vmem>>, %arg16: memref<8x1xf32, #tpu.memory_space<vmem>>, %arg17: memref<8x1xf32, #tpu.memory_space<vmem>>, %arg18: memref<8x128xf32, #tpu.memory_space<vmem>>) attributes {dimension_semantics = [#tpu.dimension_semantics<parallel>, #tpu.dimension_semantics<parallel>, #tpu.dimension_semantics<arbitrary>], iteration_bounds = array<i64: 2, 1, 1>, scalar_prefetch = 0 : i64, scratch_operands = 4 : i64, tpu.core_type = #tpu.core_type<tc>, window_params = [{transform_indices = @transform_0, window_bounds = array<i64: 1, 8, 128>}, {transform_indices = @transform_1, window_bounds = array<i64: 1, 8, 128>}, {transform_indices = @transform_2, window_bounds = array<i64: 1, 8, 128>}, {pipeline_mode = #tpu.pipeline_mode<synchronous>, transform_indices = @transform_3, window_bounds = array<i64: 128, 128>}, {pipeline_mode = #tpu.pipeline_mode<synchronous>, transform_indices = @transform_4, window_bounds = array<i64: 1, 128>}, {pipeline_mode = #tpu.pipeline_mode<synchronous>, transform_indices = @transform_5, window_bounds = array<i64: 128, 128>}, {pipeline_mode = #tpu.pipeline_mode<synchronous>, transform_indices = @transform_6, window_bounds = array<i64: 1, 128>}, {pipeline_mode = #tpu.pipeline_mode<synchronous>, transform_indices = @transform_7, window_bounds = array<i64: 128, 128>}, {pipeline_mode = #tpu.pipeline_mode<synchronous>, transform_indices = @transform_8, window_bounds = array<i64: 1, 128>}, {pipeline_mode = #tpu.pipeline_mode<synchronous>, transform_indices = @transform_9, window_bounds = array<i64: 128, 128>}, {pipeline_mode = #tpu.pipeline_mode<synchronous>, transform_indices = @transform_10, window_bounds = array<i64: 1, 128>}, {transform_indices = @transform_11, window_bounds = array<i64: 1, 8, 128>}]} {
    %c0_i32 = arith.constant 0 : i32
    %0 = arith.cmpi eq, %arg2, %c0_i32 : i32
    %1 = arith.extui %0 : i1 to i32
    %c0_i32_0 = arith.constant 0 : i32
    %2 = arith.cmpi ne, %1, %c0_i32_0 : i32
    scf.if %2 {
      %c0_35 = arith.constant 0 : index
      %c0_36 = arith.constant 0 : index
      %c0_37 = arith.constant 0 : index
      %44 = vector.load %arg3[%c0_35, %c0_36, %c0_37] : memref<1x8x128xf32, #tpu.memory_space<vmem>>, vector<1x8x128xf32>
      %45 = vector.shape_cast %44 : vector<1x8x128xf32> to vector<8x128xf32>
      %c0_38 = arith.constant 0 : index
      %c0_39 = arith.constant 0 : index
      %46 = vector.load %arg6[%c0_38, %c0_39] : memref<128x128xf32, #tpu.memory_space<vmem>>, vector<128x128xf32>
      %cst_40 = arith.constant dense<0.000000e+00> : vector<8x128xf32>
      %47 = tpu.matmul %45, %46, %cst_40 {dimension_numbers = #tpu.dot_dimension_numbers<[1], [0], [0], [1], [0, 0, 1, 1], [], []>} : vector<8x128xf32>, vector<128x128xf32>, vector<8x128xf32> -> vector<8x128xf32>
      %c0_41 = arith.constant 0 : index
      %c0_42 = arith.constant 0 : index
      %48 = vector.load %arg7[%c0_41, %c0_42] : memref<1x128xf32, #tpu.memory_space<vmem>>, vector<1x128xf32>
      %49 = vector.broadcast %48 : vector<1x128xf32> to vector<8x128xf32>
      %50 = arith.addf %47, %49 : vector<8x128xf32>
      %cst_43 = arith.constant 0.176776692 : f32
      %51 = vector.broadcast %cst_43 : f32 to vector<8x128xf32>
      %52 = arith.mulf %50, %51 : vector<8x128xf32>
      %c0_44 = arith.constant 0 : index
      %c0_45 = arith.constant 0 : index
      %53 = vector.load %arg15[%c0_44, %c0_45] : memref<8x128xf32, #tpu.memory_space<vmem>>, vector<8x128xf32>
      tpu.vector_store %arg15[%c0_44, %c0_45], %52 {strides = array<i32>} : memref<8x128xf32, #tpu.memory_space<vmem>>, vector<8x128xf32>,
      %cst_46 = arith.constant 0xFF800000 : f32
      %54 = vector.broadcast %cst_46 : f32 to vector<8x1xf32>
      %c0_47 = arith.constant 0 : index
      %c0_48 = arith.constant 0 : index
      %55 = vector.load %arg16[%c0_47, %c0_48] : memref<8x1xf32, #tpu.memory_space<vmem>>, vector<8x1xf32>
      tpu.vector_store %arg16[%c0_47, %c0_48], %54 {strides = array<i32>} : memref<8x1xf32, #tpu.memory_space<vmem>>, vector<8x1xf32>,
      %cst_49 = arith.constant 0.000000e+00 : f32
      %56 = vector.broadcast %cst_49 : f32 to vector<8x1xf32>
      %c0_50 = arith.constant 0 : index
      %c0_51 = arith.constant 0 : index
      %57 = vector.load %arg17[%c0_50, %c0_51] : memref<8x1xf32, #tpu.memory_space<vmem>>, vector<8x1xf32>
      tpu.vector_store %arg17[%c0_50, %c0_51], %56 {strides = array<i32>} : memref<8x1xf32, #tpu.memory_space<vmem>>, vector<8x1xf32>,
      %cst_52 = arith.constant 0.000000e+00 : f32
      %58 = vector.broadcast %cst_52 : f32 to vector<8x128xf32>
      %c0_53 = arith.constant 0 : index
      %c0_54 = arith.constant 0 : index
      %59 = vector.load %arg18[%c0_53, %c0_54] : memref<8x128xf32, #tpu.memory_space<vmem>>, vector<8x128xf32>
      tpu.vector_store %arg18[%c0_53, %c0_54], %58 {strides = array<i32>} : memref<8x128xf32, #tpu.memory_space<vmem>>, vector<8x128xf32>,
    } else {
    }
    %c0 = arith.constant 0 : index
    %c0_1 = arith.constant 0 : index
    %c0_2 = arith.constant 0 : index
    %3 = vector.load %arg4[%c0, %c0_1, %c0_2] : memref<1x8x128xf32, #tpu.memory_space<vmem>>, vector<1x8x128xf32>
    %4 = vector.shape_cast %3 : vector<1x8x128xf32> to vector<8x128xf32>
    %c0_3 = arith.constant 0 : index
    %c0_4 = arith.constant 0 : index
    %c0_5 = arith.constant 0 : index
    %5 = vector.load %arg5[%c0_3, %c0_4, %c0_5] : memref<1x8x128xf32, #tpu.memory_space<vmem>>, vector<1x8x128xf32>
    %6 = vector.shape_cast %5 : vector<1x8x128xf32> to vector<8x128xf32>
    %c0_6 = arith.constant 0 : index
    %c0_7 = arith.constant 0 : index
    %7 = vector.load %arg8[%c0_6, %c0_7] : memref<128x128xf32, #tpu.memory_space<vmem>>, vector<128x128xf32>
    %cst = arith.constant dense<0.000000e+00> : vector<8x128xf32>
    %8 = tpu.matmul %4, %7, %cst {dimension_numbers = #tpu.dot_dimension_numbers<[1], [0], [0], [1], [0, 0, 1, 1], [], []>} : vector<8x128xf32>, vector<128x128xf32>, vector<8x128xf32> -> vector<8x128xf32>
    %c0_8 = arith.constant 0 : index
    %c0_9 = arith.constant 0 : index
    %9 = vector.load %arg9[%c0_8, %c0_9] : memref<1x128xf32, #tpu.memory_space<vmem>>, vector<1x128xf32>
    %10 = vector.broadcast %9 : vector<1x128xf32> to vector<8x128xf32>
    %11 = arith.addf %8, %10 : vector<8x128xf32>
    %c0_10 = arith.constant 0 : index
    %c0_11 = arith.constant 0 : index
    %12 = vector.load %arg10[%c0_10, %c0_11] : memref<128x128xf32, #tpu.memory_space<vmem>>, vector<128x128xf32>
    %cst_12 = arith.constant dense<0.000000e+00> : vector<8x128xf32>
    %13 = tpu.matmul %6, %12, %cst_12 {dimension_numbers = #tpu.dot_dimension_numbers<[1], [0], [0], [1], [0, 0, 1, 1], [], []>} : vector<8x128xf32>, vector<128x128xf32>, vector<8x128xf32> -> vector<8x128xf32>
    %c0_13 = arith.constant 0 : index
    %c0_14 = arith.constant 0 : index
    %14 = vector.load %arg11[%c0_13, %c0_14] : memref<1x128xf32, #tpu.memory_space<vmem>>, vector<1x128xf32>
    %15 = vector.broadcast %14 : vector<1x128xf32> to vector<8x128xf32>
    %16 = arith.addf %13, %15 : vector<8x128xf32>
    %c0_15 = arith.constant 0 : index
    %c0_16 = arith.constant 0 : index
    %17 = vector.load %arg15[%c0_15, %c0_16] : memref<8x128xf32, #tpu.memory_space<vmem>>, vector<8x128xf32>
    %cst_17 = arith.constant dense<0.000000e+00> : vector<8x8xf32>
    %18 = tpu.matmul %17, %11, %cst_17 {dimension_numbers = #tpu.dot_dimension_numbers<[1], [1], [0], [0], [0, 0, 1, 0], [], []>} : vector<8x128xf32>, vector<8x128xf32>, vector<8x8xf32> -> vector<8x8xf32>
    %c0_18 = arith.constant 0 : index
    %c0_19 = arith.constant 0 : index
    %19 = vector.load %arg16[%c0_18, %c0_19] : memref<8x1xf32, #tpu.memory_space<vmem>>, vector<8x1xf32>
    %cst_20 = arith.constant dense<0xFF800000> : vector<8xf32>
    %20 = vector.multi_reduction <maximumf>, %18, %cst_20 [1] : vector<8x8xf32> to vector<8xf32>
    %21 = vector.shape_cast %20 : vector<8xf32> to vector<8x1xf32>
    %22 = arith.maximumf %19, %21 : vector<8x1xf32>
    %23 = arith.subf %19, %22 : vector<8x1xf32>
    %24 = math.exp %23 : vector<8x1xf32>
    %25 = vector.broadcast %22 : vector<8x1xf32> to vector<8x8xf32>
    %26 = arith.subf %18, %25 : vector<8x8xf32>
    %27 = math.exp %26 : vector<8x8xf32>
    %c0_21 = arith.constant 0 : index
    %c0_22 = arith.constant 0 : index
    %28 = vector.load %arg17[%c0_21, %c0_22] : memref<8x1xf32, #tpu.memory_space<vmem>>, vector<8x1xf32>
    %29 = arith.mulf %24, %28 : vector<8x1xf32>
    %cst_23 = arith.constant dense<0.000000e+00> : vector<8xf32>
    %30 = vector.multi_reduction <add>, %27, %cst_23 [1] : vector<8x8xf32> to vector<8xf32>
    %31 = vector.shape_cast %30 : vector<8xf32> to vector<8x1xf32>
    %32 = arith.addf %29, %31 : vector<8x1xf32>
    %c0_24 = arith.constant 0 : index
    %c0_25 = arith.constant 0 : index
    %33 = vector.load %arg17[%c0_24, %c0_25] : memref<8x1xf32, #tpu.memory_space<vmem>>, vector<8x1xf32>
    tpu.vector_store %arg17[%c0_24, %c0_25], %32 {strides = array<i32>} : memref<8x1xf32, #tpu.memory_space<vmem>>, vector<8x1xf32>,
    %cst_26 = arith.constant dense<0.000000e+00> : vector<8x128xf32>
    %34 = tpu.matmul %27, %16, %cst_26 {dimension_numbers = #tpu.dot_dimension_numbers<[1], [0], [0], [1], [0, 0, 1, 1], [], []>} : vector<8x8xf32>, vector<8x128xf32>, vector<8x128xf32> -> vector<8x128xf32>
    %c0_27 = arith.constant 0 : index
    %c0_28 = arith.constant 0 : index
    %35 = vector.load %arg18[%c0_27, %c0_28] : memref<8x128xf32, #tpu.memory_space<vmem>>, vector<8x128xf32>
    %36 = vector.broadcast %24 : vector<8x1xf32> to vector<8x128xf32>
    %37 = arith.mulf %36, %35 : vector<8x128xf32>
    %38 = arith.addf %37, %34 : vector<8x128xf32>
    %c0_29 = arith.constant 0 : index
    %c0_30 = arith.constant 0 : index
    %39 = vector.load %arg18[%c0_29, %c0_30] : memref<8x128xf32, #tpu.memory_space<vmem>>, vector<8x128xf32>
    tpu.vector_store %arg18[%c0_29, %c0_30], %38 {strides = array<i32>} : memref<8x128xf32, #tpu.memory_space<vmem>>, vector<8x128xf32>,
    %c0_31 = arith.constant 0 : index
    %c0_32 = arith.constant 0 : index
    %40 = vector.load %arg16[%c0_31, %c0_32] : memref<8x1xf32, #tpu.memory_space<vmem>>, vector<8x1xf32>
    tpu.vector_store %arg16[%c0_31, %c0_32], %22 {strides = array<i32>} : memref<8x1xf32, #tpu.memory_space<vmem>>, vector<8x1xf32>,
    %c0_i32_33 = arith.constant 0 : i32
    %41 = arith.cmpi eq, %arg2, %c0_i32_33 : i32
    %42 = arith.extui %41 : i1 to i32
    %c0_i32_34 = arith.constant 0 : i32
    %43 = arith.cmpi ne, %42, %c0_i32_34 : i32
    scf.if %43 {
      %c0_35 = arith.constant 0 : index
      %c0_36 = arith.constant 0 : index
      %44 = vector.load %arg17[%c0_35, %c0_36] : memref<8x1xf32, #tpu.memory_space<vmem>>, vector<8x1xf32>
      %45 = tpu.reciprocal %44 : vector<8x1xf32> -> vector<8x1xf32>
      %c0_37 = arith.constant 0 : index
      %c0_38 = arith.constant 0 : index
      %46 = vector.load %arg18[%c0_37, %c0_38] : memref<8x128xf32, #tpu.memory_space<vmem>>, vector<8x128xf32>
      %47 = vector.broadcast %45 : vector<8x1xf32> to vector<8x128xf32>
      %48 = arith.mulf %46, %47 : vector<8x128xf32>
      %c0_39 = arith.constant 0 : index
      %c0_40 = arith.constant 0 : index
      %49 = vector.load %arg12[%c0_39, %c0_40] : memref<128x128xf32, #tpu.memory_space<vmem>>, vector<128x128xf32>
      %cst_41 = arith.constant dense<0.000000e+00> : vector<8x128xf32>
      %50 = tpu.matmul %48, %49, %cst_41 {dimension_numbers = #tpu.dot_dimension_numbers<[1], [0], [0], [1], [0, 0, 1, 1], [], []>} : vector<8x128xf32>, vector<128x128xf32>, vector<8x128xf32> -> vector<8x128xf32>
      %c0_42 = arith.constant 0 : index
      %c0_43 = arith.constant 0 : index
      %51 = vector.load %arg13[%c0_42, %c0_43] : memref<1x128xf32, #tpu.memory_space<vmem>>, vector<1x128xf32>
      %52 = vector.broadcast %51 : vector<1x128xf32> to vector<8x128xf32>
      %53 = arith.addf %50, %52 : vector<8x128xf32>
      %c0_44 = arith.constant 0 : index
      %c0_45 = arith.constant 0 : index
      %c0_46 = arith.constant 0 : index
      %54 = vector.load %arg14[%c0_44, %c0_45, %c0_46] : memref<1x8x128xf32, #tpu.memory_space<vmem>>, vector<1x8x128xf32>
      %55 = vector.shape_cast %54 : vector<1x8x128xf32> to vector<8x128xf32>
      %56 = vector.shape_cast %53 : vector<8x128xf32> to vector<1x8x128xf32>
      tpu.vector_store %arg14[%c0_44, %c0_45, %c0_46], %56 {strides = array<i32>} : memref<1x8x128xf32, #tpu.memory_space<vmem>>, vector<1x8x128xf32>,
    } else {
    }
    return
  }
  func.func @transform_0(%arg0: i32, %arg1: i32, %arg2: i32) -> (i32, i32, i32) {
    %c0_i32 = arith.constant 0 : i32
    %c0_i32_0 = arith.constant 0 : i32
    return %arg0, %arg1, %c0_i32 : i32, i32, i32
  }
  func.func @transform_1(%arg0: i32, %arg1: i32, %arg2: i32) -> (i32, i32, i32) {
    %c0_i32 = arith.constant 0 : i32
    %c0_i32_0 = arith.constant 0 : i32
    return %arg0, %arg2, %c0_i32 : i32, i32, i32
  }
  func.func @transform_2(%arg0: i32, %arg1: i32, %arg2: i32) -> (i32, i32, i32) {
    %c0_i32 = arith.constant 0 : i32
    %c0_i32_0 = arith.constant 0 : i32
    return %arg0, %arg2, %c0_i32 : i32, i32, i32
  }
  func.func @transform_3(%arg0: i32, %arg1: i32, %arg2: i32) -> (i32, i32) {
    %c0_i32 = arith.constant 0 : i32
    %c0_i32_0 = arith.constant 0 : i32
    %c0_i32_1 = arith.constant 0 : i32
    return %c0_i32, %c0_i32_0 : i32, i32
  }
  func.func @transform_4(%arg0: i32, %arg1: i32, %arg2: i32) -> (i32, i32) {
    %c0_i32 = arith.constant 0 : i32
    %c0_i32_0 = arith.constant 0 : i32
    %c0_i32_1 = arith.constant 0 : i32
    return %c0_i32, %c0_i32_0 : i32, i32
  }
  func.func @transform_5(%arg0: i32, %arg1: i32, %arg2: i32) -> (i32, i32) {
    %c0_i32 = arith.constant 0 : i32
    %c0_i32_0 = arith.constant 0 : i32
    %c0_i32_1 = arith.constant 0 : i32
    return %c0_i32, %c0_i32_0 : i32, i32
  }
  func.func @transform_6(%arg0: i32, %arg1: i32, %arg2: i32) -> (i32, i32) {
    %c0_i32 = arith.constant 0 : i32
    %c0_i32_0 = arith.constant 0 : i32
    %c0_i32_1 = arith.constant 0 : i32
    return %c0_i32, %c0_i32_0 : i32, i32
  }
  func.func @transform_7(%arg0: i32, %arg1: i32, %arg2: i32) -> (i32, i32) {
    %c0_i32 = arith.constant 0 : i32
    %c0_i32_0 = arith.constant 0 : i32
    %c0_i32_1 = arith.constant 0 : i32
    return %c0_i32, %c0_i32_0 : i32, i32
  }
  func.func @transform_8(%arg0: i32, %arg1: i32, %arg2: i32) -> (i32, i32) {
    %c0_i32 = arith.constant 0 : i32
    %c0_i32_0 = arith.constant 0 : i32
    %c0_i32_1 = arith.constant 0 : i32
    return %c0_i32, %c0_i32_0 : i32, i32
  }
  func.func @transform_9(%arg0: i32, %arg1: i32, %arg2: i32) -> (i32, i32) {
    %c0_i32 = arith.constant 0 : i32
    %c0_i32_0 = arith.constant 0 : i32
    %c0_i32_1 = arith.constant 0 : i32
    return %c0_i32, %c0_i32_0 : i32, i32
  }
  func.func @transform_10(%arg0: i32, %arg1: i32, %arg2: i32) -> (i32, i32) {
    %c0_i32 = arith.constant 0 : i32
    %c0_i32_0 = arith.constant 0 : i32
    %c0_i32_1 = arith.constant 0 : i32
    return %c0_i32, %c0_i32_0 : i32, i32
  }
  func.func @transform_11(%arg0: i32, %arg1: i32, %arg2: i32) -> (i32, i32, i32) {
    %c0_i32 = arith.constant 0 : i32
    %c0_i32_0 = arith.constant 0 : i32
    return %arg0, %arg1, %c0_i32 : i32, i32, i32
  }
}

</mosaic_0001>

<bundles_post_ra>
// kernel: tpu_custom_call.1
= control target key start
LH: loop header
LB: loop body
LE: loop exit
PB: predicated region body
PF: predicated region fallthrough
CT: control target
= control target key end

     0   :  { %s2624_s0 = inlined_call_operand.hbm [shape: f32[2,8,128], index: 0, kind: input, shape index: {}]   ;;  %s2625_s1 = inlined_call_operand.hbm [shape: f32[2,8,128], index: 1, kind: input, shape index: {}]   ;;  %s2626_s2 = inlined_call_operand.hbm [shape: f32[2,8,128], index: 2, kind: input, shape index: {}]   ;;  %s2627_s3 = inlined_call_operand.hbm [shape: f32[128,128], index: 3, kind: input, shape index: {}]   ;;  %s2628_s4 = inlined_call_operand.vmem [shape: f32[1,128], index: 4, kind: input, shape index: {}]   ;;  %s2629_s5 = inlined_call_operand.hbm [shape: f32[128,128], index: 5, kind: input, shape index: {}]   ;;  %s2630_s6 = inlined_call_operand.vmem [shape: f32[1,128], index: 6, kind: input, shape index: {}]   ;;  %s2631_s7 = inlined_call_operand.hbm [shape: f32[128,128], index: 7, kind: input, shape index: {}]   ;;  %s2632_s8 = inlined_call_operand.vmem [shape: f32[1,128], index: 8, kind: input, shape index: {}]   ;;  %s2633_s9 = inlined_call_operand.hbm [shape: f32[128,128], index: 9, kind: input, shape index: {}]   ;;  %s2634_s10 = inlined_call_operand.vmem [shape: f32[1,128], index: 10, kind: input, shape index: {}]   ;;  %s2635_s11 = inlined_call_operand.hbm [shape: f32[2,8,128], index: 11, kind: output, shape index: {}]  }
   0x1   :  { %2662 = sst [smem:[#allocation32_spill]] %s2625_s1 }
   0x2   :  { %2663 = sst [smem:[#allocation33_spill]] %s2627_s3 }
   0x3   :  { %2664 = sst [smem:[#allocation34_spill]] %s2631_s7 }
   0x4   :  { %2665 = sst [smem:[#allocation35_spill]] %s2632_s8 }
   0x5   :  { %2666 = sst [smem:[#allocation36_spill]] %s2634_s10 }
   0x6   :  { %2667 = sst [smem:[#allocation37_spill]] %s2635_s11 }
   0x7   :  { %16 = vsyncpa [#allocation7], 0 }
   0x8   :  { %18 = vsyncpa [#allocation7 + $0x1], 0 }
   0x9   :  { %19 = vsyncpa [#allocation10], 0 }
   0xa   :  { %21 = vsyncpa [#allocation10 + $0x1], 0 }
   0xb   :  { %22 = vsyncpa [#allocation13], 0 }
   0xc   :  { %23 = vsyncpa [#allocation16], 0 }
   0xd   :  { %24 = vsyncpa [#allocation8], 0 }
   0xe   :  { %26 = vsyncpa [#allocation8 + $0x1], 0  ;;  %s2170_s17 = smov 0   ;;  %s2172_s18 = smov 0  }
   0xf   :  { %s2174_s19 = smov 0   ;;  %s2176_s20 = smov 0  }
  0x10   :  { %s2178_s21 = smov 0   ;;  %s2180_s22 = smov 0  }
  0x11 LB: > { %2668 = sst [smem:[#allocation24_spill]] %s2073_s17  ;;  %s2201_s23 = sadd.s32 4294967295, %s2093_s22   ;;  %s2093_s22 = sphi %s2180_s22, %s32_s22   ;;  %s2089_s21 = sphi %s2178_s21, %s2715_s21   ;;  %s2085_s20 = sphi %s2176_s20, %s2714_s20   ;;  %s2081_s19 = sphi %s2174_s19, %s2718_s19   ;;  %s2077_s18 = sphi %s2172_s18, %s2717_s18   ;;  %s2073_s17 = sphi %s2170_s17, %s2716_s17  }
  0x12   : > { %2669 = sst [smem:[#allocation25_spill]] %s2085_s20  ;;  %p1321_p0 = scmp.ge.s32.totalorder %s2093_s22, 1 }
  0x13   : > { %2670 = sst [smem:[#allocation26_spill]] %s2089_s21  ;;  %p2646_p1 = scmp.eq.s32.totalorder %s2201_s23, 0 }
  0x14   : > { %2671 = sst [smem:[#allocation27_spill]] %s2093_s22  ;;  %p336_p2 = scmp.lt.s32.totalorder %s2093_s22, 3 }
  0x15   : > { %s2095_s25 = smov [#allocation12]   ;;  %s2096_s28 = smov [#allocation15]  }
  0x16   : > { %p2206_p3 = pnand %p1321_p0, %p336_p2  ;;  %s348_s26 = sshll.u32 %s2095_s25, 4  ;;  %s2210_s26 = int_to_ptr.vmem [resolvable:$true] %s348_s26 }
  0x17   : > { %s380_s29 = sshll.u32 %s2096_s28, 4  ;;  %s2674_s3 = sld [smem:[#allocation33_spill]]  ;;  %s2221_s29 = int_to_ptr.vmem [resolvable:$true] %s380_s29 }
  0x18   : > { %s2672_s24 = scalar_select %p2206_p3, 1, 0 }
  0x19   : > { %p1693_p4 = pneg %p2206_p3 }
  0x1b   : > { %p2217_p6 = pnand %p1693_p4, %p2646_p1 }
  0x1d   : > { %s2673_s27 = scalar_select %p2217_p6, 1, 0 }
  0x1e   : > { %s1797_s13 = scalar_lea.hbm %s2674_s3, 2048  ;;  %p2231_p8 = pneg %p2217_p6 }
  0x1f   : > { %p1798_p7 = scmp.ne.s32.totalorder %s2674_s3, %s1797_s13  ;;  %p1804_p11 = scmp.lt.u32.totalorder %s1797_s13, %s2674_s3 }
  0x20   : > { %s2675_s16 = scalar_select %p2231_p8, 1, 0 }
  0x21   : > { %p1800_p9 = pnand %p2231_p8, %p1798_p7 }
  0x23   : > { %p1801_p10 = pneg %p1800_p9 }
  0x25   : > { %p1806_p12 = pnand %p1804_p11, %p1801_p10 }
  0x27   : > { %1809 = shalt.err (!%p1806_p12)
}
  0x28   : > { %s1810_s30 = scalar_lea.vmem %s2210_s26, 2048  ;;  %p1818_p4 = scmp.lt.s32.totalorder %s2210_s26, %s2210_s26 }
  0x29   : > { %p1811_p13 = scmp.ne.s32.totalorder %s2210_s26, %s1810_s30  ;;  %p1819_p5 = scmp.lt.s32.totalorder %s1810_s30, %s1810_s30 }
  0x2b   : > { %p1813_p0 = pnand %p1811_p13, %p2231_p8  ;;  %p1820_p7 = por %p1819_p5, %p1818_p4 }
  0x2d   : > { %p1814_p2 = pneg %p1813_p0 }
  0x2f   : > { %p1821_p9 = pnand %p1820_p7, %p1814_p2 }
  0x31   : > { %1824 = shalt.err (!%p1821_p9)
}
  0x32   : > { %s2637_s12 = smov 128   ;;  %s2639_s13 = smov 8  }
  0x33   : > { %1696 = dma.hbm_to_vmem [thread:$0]  (!%p2217_p6), %s2674_s3, 2048, %s2210_s26, [#allocation13], %s2637_s12, %s2637_s12, %s2639_s13  }
  0x34   : > { %s2676_s7 = sld [smem:[#allocation34_spill]] }
  0x3a   : > { %s1825_s30 = scalar_lea.hbm %s2676_s7, 2048 }
  0x3b   : > { %p1826_p5 = scmp.ne.s32.totalorder %s2676_s7, %s1825_s30  ;;  %p1832_p12 = scmp.lt.u32.totalorder %s1825_s30, %s2676_s7 }
  0x3d   : > { %p1828_p10 = pnand %p1826_p5, %p2231_p8 }
  0x3f   : > { %p1829_p11 = pneg %p1828_p10 }
  0x41   : > { %p1834_p13 = pnand %p1832_p12, %p1829_p11 }
  0x43   : > { %1837 = shalt.err (!%p1834_p13)
}
  0x44   : > { %s1838_s26 = scalar_lea.vmem %s2221_s29, 2048  ;;  %p1846_p7 = scmp.lt.s32.totalorder %s2221_s29, %s2221_s29 }
  0x45   : > { %p1839_p0 = scmp.ne.s32.totalorder %s2221_s29, %s1838_s26  ;;  %p1847_p9 = scmp.lt.s32.totalorder %s1838_s26, %s1838_s26 }
  0x47   : > { %p1841_p2 = pnand %p1839_p0, %p2231_p8  ;;  %p1848_p5 = por %p1847_p9, %p1846_p7 }
  0x49   : > { %p1842_p4 = pneg %p1841_p2 }
  0x4b   : > { %p1849_p10 = pnand %p1848_p5, %p1842_p4 }
  0x4d   : > { %1852 = shalt.err (!%p1849_p10)
}
  0x4e   : > { %1702 = dma.hbm_to_vmem [thread:$0]  (!%p2217_p6), %s2676_s7, 2048, %s2221_s29, [#allocation16], %s2637_s12, %s2637_s12, %s2639_s13  }
  0x4f   : > { %s1320_s11 = sadd.s32 4294967294, %s2093_s22   ;;  %s51_s20 = sadd.s32 1, %s2089_s21 }
  0x50   : > { %p53_p11 = scmp.ge.s32.totalorder %s51_s20, 2  ;;  %s60_s14 = sadd.s32 1, %s2081_s19 }
  0x51   : > { %p67_p12 = scmp.ne.s32.totalorder %s2081_s19, %s2077_s18  ;;  %p68_p13 = scmp.eq.s32.totalorder %s2093_s22, 0 }
  0x52   : > { %s2720_s20 = smov (%p53_p11, %s51_s20), 0  ;;  %p73_p2 = scmp.ne.s32.totalorder %s2077_s18, %s2073_s17 }
  0x53   : > { %2677 = sst [smem:[#allocation28_spill]] %s2720_s20  ;;  %p2289_p0 = por %p68_p13, %p67_p12 }
  0x54   : > { %s55_s29 = ssub.s32 %s2089_s21, %s2720_s20  ;;  %p323_p4 = scmp.eq.s32.totalorder %s2201_s23, 1 }
  0x55   : > { %p58_p7 = scmp.eq.s32.totalorder %s55_s29, 0  ;;  %p2300_p9 = por %p2646_p1, %p73_p2 }
  0x56   : > { %p2304_p5 = por %p323_p4, %p67_p12  ;;  %p329_p10 = scmp.eq.s32.totalorder %s1320_s11, 1 }
  0x57   : > { %s2679_s25 = scalar_select %p2300_p9, 1, 0 }
  0x58   : > { %s2680_s28 = scalar_select %p2304_p5, 1, 0 }
  0x59   : > { %s2309_s30 = scalar_select %p58_p7, %s2081_s19, %s60_s14  }
  0x5a   : > { %2681 = sst [smem:[#allocation29_spill]] %s2680_s28  ;;  %p2311_p11 = por %p329_p10, %p73_p2 }
  0x5b   : > { %2682 = sst [smem:[#allocation30_spill]] %s2309_s30  ;;  %p1724_p13 = scmp.lt.s32.totalorder %s2093_s22, 2 }
  0x5c   : > { %s2683_s26 = scalar_select %p2311_p11, 1, 0 }
  0x5d   : > { %s2641_s8 = sand.u32 1, %s2081_s19   ;;  %s2318_s10 = sshll.u32 %s2089_s21, 7 }
  0x5e   : > { %2684 = sst [smem:[#allocation31_spill]] %s2683_s26  ;;  %s2322_s29 = sshll.u32 %s2641_s8, 3 }
  0x5f   : > { %p2326_p12 = pnand %p1724_p13, %p2289_p0  ;;  %s432_s11 = sand.u32 1, %s2093_s22  }
  0x60   : > { %s2686_s1 = sld [smem:[#allocation32_spill]]  ;;  %s436_s7 = scalar_lea.vmem [#allocation9], %s2322_s29 }
  0x61   : > { %s2685_s12 = scalar_select %p2326_p12, 1, 0 }
  0x62   : > { %s444_s8 = sshll.u32 %s436_s7, 4  ;;  %s2340_s15 = scalar_lea.sflag [#allocation10], %s432_s11  ;;  %s2338_s8 = int_to_ptr.vmem [resolvable:$true] %s444_s8 }
  0x63   : > { %p2346_p2 = pneg %p2326_p12 }
  0x65   : > { %s2687_s21 = scalar_select %p2346_p2, 1, 0 }
  0x66   : > { %s2335_s3 = scalar_lea.hbm %s2686_s1, %s2318_s10  ;;  %s1858_s30 = scalar_lea.hbm %s2686_s1, 256 }
  0x67   : > { %s1853_s20 = scalar_lea.hbm %s2335_s3, 128  ;;  %p1859_p10 = scmp.lt.u32.totalorder %s2335_s3, %s2686_s1 }
  0x68   : > { %p1854_p0 = scmp.ne.s32.totalorder %s2335_s3, %s1853_s20  ;;  %p1860_p13 = scmp.lt.u32.totalorder %s1858_s30, %s1853_s20 }
  0x69   : > { %p1862_p11 = scmp.lt.u32.totalorder %s1853_s20, %s2335_s3 }
  0x6a   : > { %p1856_p4 = pnand %p2346_p2, %p1854_p0  ;;  %p1861_p1 = por %p1860_p13, %p1859_p10 }
  0x6c   : > { %p1857_p7 = pneg %p1856_p4  ;;  %p1863_p5 = por %p1862_p11, %p1861_p1 }
  0x6e   : > { %p1864_p9 = pnand %p1863_p5, %p1857_p7 }
  0x70   : > { %1867 = shalt.err (!%p1864_p9)
}
  0x71   : > { %s1868_s11 = scalar_lea.vmem %s2338_s8, 128  ;;  %s2099_s13 = smov [#allocation9]  }
  0x72   : > { %p1869_p0 = scmp.ne.s32.totalorder %s2338_s8, %s1868_s11  ;;  %s1873_s14 = sshll.u32 %s2099_s13, 4  ;;  %s1874_s14 = int_to_ptr.vmem [resolvable:$false] %s1873_s14 }
  0x73   : > { %s1875_s22 = scalar_lea.vmem %s1874_s14, 256  ;;  %p1876_p6 = scmp.lt.s32.totalorder %s2338_s8, %s1874_s14 }
  0x74   : > { %p1871_p4 = pnand %p1869_p0, %p2346_p2  ;;  %p1877_p8 = scmp.lt.s32.totalorder %s1875_s22, %s1868_s11 }
  0x76   : > { %p1872_p3 = pneg %p1871_p4  ;;  %p1878_p10 = por %p1877_p8, %p1876_p6 }
  0x78   : > { %p1879_p13 = pnand %p1878_p10, %p1872_p3 }
  0x7a   : > { %1882 = shalt.err (!%p1879_p13)
}
  0x7b   : > { %1712 = dma.hbm_to_vmem [thread:$0]  (!%p2326_p12), %s2335_s3, 128, %s2338_s8, %s2340_s15  }
  0x7c   : > { %s2100_s20 = smov [#allocation14]   ;;  %s2101_s7 = smov [#allocation17]  }
  0x7d   : > { %s364_s30 = sshll.u32 %s2100_s20, 4  ;;  %s396_s1 = sshll.u32 %s2101_s7, 4  ;;  %s365_s30 = int_to_ptr.vmem [resolvable:$true] %s364_s30  ;;  %s397_s1 = int_to_ptr.vmem [resolvable:$true] %s396_s1 }
  0x7e   : > { %s1883_s14 = scalar_lea.hbm %s2629_s5, 2048  ;;  %p2688_p3 = scmp.ne.s32.totalorder %s2675_s16, 0 }
  0x7f   : > { %p1884_p1 = scmp.ne.s32.totalorder %s2629_s5, %s1883_s14  ;;  %p1890_p9 = scmp.lt.u32.totalorder %s1883_s14, %s2629_s5 }
  0x81   : > { %p1886_p6 = pnand %p1884_p1, %p2688_p3 }
  0x83   : > { %p1887_p8 = pneg %p1886_p6 }
  0x85   : > { %p1892_p5 = pnand %p1890_p9, %p1887_p8 }
  0x87   : > { %1895 = shalt.err (!%p1892_p5)
}
  0x88   : > { %s1896_s3 = scalar_lea.vmem %s365_s30, 2048  ;;  %p1904_p4 = scmp.lt.s32.totalorder %s365_s30, %s365_s30 }
  0x89   : > { %p1897_p11 = scmp.ne.s32.totalorder %s365_s30, %s1896_s3  ;;  %p1905_p10 = scmp.lt.s32.totalorder %s1896_s3, %s1896_s3 }
  0x8b   : > { %p1899_p7 = pnand %p1897_p11, %p2688_p3  ;;  %p1906_p13 = por %p1905_p10, %p1904_p4 }
  0x8d   : > { %p1900_p0 = pneg %p1899_p7 }
  0x8f   : > { %p1907_p12 = pnand %p1906_p13, %p1900_p0 }
  0x91   : > { %1910 = shalt.err (!%p1907_p12)
}
  0x92   : > { %p2689_p1 = scmp.ne.s32.totalorder %s2673_s27, 0  ;;  %s2690_s26 = smov 8  }
  0x93   : > { %s2691_s8 = smov 128   ;;  %s1911_s13 = scalar_lea.hbm %s2633_s9, 2048 }
  0x94   : > { %1699 = dma.hbm_to_vmem [thread:$0]  (!%p2689_p1), %s2629_s5, 2048, %s365_s30, [#allocation13], %s2691_s8, %s2691_s8, %s2690_s26  }
  0x95   : > { %p1912_p6 = scmp.ne.s32.totalorder %s2633_s9, %s1911_s13  ;;  %p1918_p9 = scmp.lt.u32.totalorder %s1911_s13, %s2633_s9 }
  0x97   : > { %p1914_p12 = pnand %p1912_p6, %p2688_p3 }
  0x99   : > { %p1915_p8 = pneg %p1914_p12 }
  0x9b   : > { %p1920_p5 = pnand %p1918_p9, %p1915_p8 }
  0x9d   : > { %1923 = shalt.err (!%p1920_p5)
}
  0x9e   : > { %s1924_s17 = scalar_lea.vmem %s397_s1, 2048  ;;  %p1932_p4 = scmp.lt.s32.totalorder %s397_s1, %s397_s1 }
  0x9f   : > { %p1925_p11 = scmp.ne.s32.totalorder %s397_s1, %s1924_s17  ;;  %p1933_p10 = scmp.lt.s32.totalorder %s1924_s17, %s1924_s17 }
  0xa1   : > { %p1927_p7 = pnand %p1925_p11, %p2688_p3  ;;  %p1934_p13 = por %p1933_p10, %p1932_p4 }
  0xa3   : > { %p1928_p0 = pneg %p1927_p7 }
  0xa5   : > { %p1935_p2 = pnand %p1934_p13, %p1928_p0 }
  0xa7   : > { %1938 = shalt.err (!%p1935_p2)
}
  0xa8   : > { %1705 = dma.hbm_to_vmem [thread:$0]  (!%p2689_p1), %s2633_s9, 2048, %s397_s1, [#allocation16], %s2691_s8, %s2691_s8, %s2690_s26  }
  0xa9   : > { %s2416_s7 = scalar_lea.hbm %s2624_s0, %s2318_s10  ;;  %s417_s27 = scalar_lea.vmem [#allocation6], %s2322_s29 }
  0xaa   : > { %s425_s13 = sshll.u32 %s417_s27, 4  ;;  %s2425_s22 = scalar_lea.hbm %s2626_s2, %s2318_s10  ;;  %s2419_s13 = int_to_ptr.vmem [resolvable:$true] %s425_s13 }
  0xab   : > { %s2692_s3 = sand.u32 1, %s2081_s19   ;;  %s1939_s26 = scalar_lea.hbm %s2416_s7, 128 }
  0xac   : > { %s414_s1 = scalar_lea.sflag [#allocation7], %s2692_s3  ;;  %p1940_p2 = scmp.ne.s32.totalorder %s2416_s7, %s1939_s26 }
  0xad   : > { %p2693_p3 = scmp.ne.s32.totalorder %s2687_s21, 0  ;;  %s1944_s30 = scalar_lea.hbm %s2624_s0, 256 }
  0xae   : > { %p1945_p12 = scmp.lt.u32.totalorder %s2416_s7, %s2624_s0  ;;  %p1946_p8 = scmp.lt.u32.totalorder %s1944_s30, %s1939_s26 }
  0xaf   : > { %p1942_p1 = pnand %p1940_p2, %p2693_p3  ;;  %p1948_p5 = scmp.lt.u32.totalorder %s1939_s26, %s2416_s7 }
  0xb0   : > { %p1947_p9 = por %p1946_p8, %p1945_p12 }
  0xb1   : > { %p1943_p6 = pneg %p1942_p1 }
  0xb2   : > { %p1949_p11 = por %p1948_p5, %p1947_p9 }
  0xb4   : > { %p1950_p7 = pnand %p1949_p11, %p1943_p6 }
  0xb6   : > { %1953 = shalt.err (!%p1950_p7)
}
  0xb7   : > { %s1954_s10 = scalar_lea.vmem %s2419_s13, 128  ;;  %s2102_s20 = smov [#allocation6]  }
  0xb8   : > { %p1955_p0 = scmp.ne.s32.totalorder %s2419_s13, %s1954_s10  ;;  %s1959_s27 = sshll.u32 %s2102_s20, 4  ;;  %s1960_s27 = int_to_ptr.vmem [resolvable:$false] %s1959_s27 }
  0xb9   : > { %s1961_s14 = scalar_lea.vmem %s1960_s27, 256  ;;  %p1962_p13 = scmp.lt.s32.totalorder %s2419_s13, %s1960_s27 }
  0xba   : > { %p1957_p4 = pnand %p1955_p0, %p2693_p3  ;;  %p1963_p2 = scmp.lt.s32.totalorder %s1961_s14, %s1954_s10 }
  0xbc   : > { %p1958_p10 = pneg %p1957_p4  ;;  %p1964_p1 = por %p1963_p2, %p1962_p13 }
  0xbe   : > { %p1965_p12 = pnand %p1964_p1, %p1958_p10 }
  0xc0   : > { %1968 = shalt.err (!%p1965_p12)
}
  0xc1   : > { %p2694_p6 = scmp.ne.s32.totalorder %s2685_s12, 0  ;;  %s455_s11 = scalar_lea.vmem [#allocation11], %s2322_s29 }
  0xc2   : > { %s463_s3 = sshll.u32 %s455_s11, 4  ;;  %s1969_s26 = scalar_lea.hbm %s2425_s22, 128  ;;  %s464_s3 = int_to_ptr.vmem [resolvable:$true] %s463_s3 }
  0xc3   : > { %1709 = dma.hbm_to_vmem [thread:$0]  (!%p2694_p6), %s2416_s7, 128, %s2419_s13, %s414_s1  }
  0xc4   : > { %p1970_p8 = scmp.ne.s32.totalorder %s2425_s22, %s1969_s26  ;;  %s1974_s30 = scalar_lea.hbm %s2626_s2, 256 }
  0xc5   : > { %p1975_p11 = scmp.lt.u32.totalorder %s2425_s22, %s2626_s2  ;;  %p1976_p7 = scmp.lt.u32.totalorder %s1974_s30, %s1969_s26 }
  0xc6   : > { %p1972_p9 = pnand %p1970_p8, %p2693_p3  ;;  %p1978_p4 = scmp.lt.u32.totalorder %s1969_s26, %s2425_s22 }
  0xc7   : > { %p1977_p0 = por %p1976_p7, %p1975_p11 }
  0xc8   : > { %p1973_p5 = pneg %p1972_p9 }
  0xc9   : > { %p1979_p10 = por %p1978_p4, %p1977_p0 }
  0xcb   : > { %p1980_p13 = pnand %p1979_p10, %p1973_p5 }
  0xcd   : > { %1983 = shalt.err (!%p1980_p13)
}
  0xce   : > { %s1984_s29 = scalar_lea.vmem %s464_s3, 128  ;;  %s2103_s7 = smov [#allocation11]  }
  0xcf   : > { %p1985_p2 = scmp.ne.s32.totalorder %s464_s3, %s1984_s29  ;;  %s1989_s13 = sshll.u32 %s2103_s7, 4  ;;  %s1990_s13 = int_to_ptr.vmem [resolvable:$false] %s1989_s13 }
  0xd0   : > { %s1991_s1 = scalar_lea.vmem %s1990_s13, 256  ;;  %p1992_p8 = scmp.lt.s32.totalorder %s464_s3, %s1990_s13 }
  0xd1   : > { %p1987_p1 = pnand %p1985_p2, %p2693_p3  ;;  %p1993_p9 = scmp.lt.s32.totalorder %s1991_s1, %s1984_s29 }
  0xd3   : > { %p1988_p12 = pneg %p1987_p1  ;;  %p1994_p6 = por %p1993_p9, %p1992_p8 }
  0xd5   : > { %p1995_p7 = pnand %p1994_p6, %p1988_p12 }
  0xd7   : > { %1998 = shalt.err (!%p1995_p7)
}
  0xd8   : > { %p2695_p11 = scmp.ne.s32.totalorder %s2685_s12, 0  ;;  %p2696_p5 = scmp.ne.s32.totalorder %s2672_s24, 0 }
  0xd9   : > { %s2472_s21 = sand.u32 (!%p2696_p5), 1, %s2077_s18   ;;  %p2697_p3 = scmp.ne.s32.totalorder (!%p2696_p5), %s2679_s25, 0 }
  0xda   : > { %1715 = dma.hbm_to_vmem [thread:$0]  (!%p2695_p11), %s2425_s22, 128, %s464_s3, %s2340_s15  }
  0xdb   : > { %472 = sbr.rel (%p2696_p5) target bundleno = 1511 (0x5e7), region = 64  ;;  %s2475_s10 = sshll.u32 (!%p2696_p5), %s2472_s21, 3 }
  0xdc   : > { %s475_s20 = scalar_lea.sflag (!%p2696_p5), [#allocation7], %s2472_s21  ;;  %s478_s27 = scalar_lea.vmem (!%p2696_p5), [#allocation6], %s2475_s10 }
  0xe2   : > { %2052 = dma.done.wait (%p2697_p3), %s475_s20, 128  }
  0xe3   : > { %2054 = vsyncadd (%p2697_p3), %s475_s20, 4294967168  ;;  %s483_s24 = sand.u32 1, %s2201_s23   ;;  %s487_s15 = scalar_lea.vmem [#allocation9], %s2475_s10 }
  0xe4   : > { %s484_s12 = scalar_lea.sflag [#allocation10], %s483_s24 }
  0xe5   : > { %2056 = dma.done.wait (%p2697_p3), %s484_s12, 256  }
  0xe6   : > { %2058 = vsyncadd (%p2697_p3), %s484_s12, 4294967040  ;;  %s496_s22 = scalar_lea.vmem [#allocation11], %s2475_s10  ;;  %p2698_p6 = scmp.eq.s32.totalorder %s2201_s23, 0 }
  0xe8   : > { %2060 = dma.done.wait (%p2698_p6), [#allocation13], 4096   ;;  %p2699_p0 = pmov %p2698_p6 }
  0xea   : > { %2062 = vsyncadd (%p2699_p0), [#allocation13], 4294963200  ;;  %p2700_p4 = pmov %p2699_p0 }
  0xeb   : > { %p2701_p10 = pmov %p2699_p0 }
  0xec   : > { %2064 = dma.done.wait (%p2700_p4), [#allocation16], 4096  }
  0xed   : > { %2066 = vsyncadd (%p2701_p10), [#allocation16], 4294963200  ;;  %v2104_v0 = vmov 0.0|0.0   ;;  %vm2105_vm0 = vmmov 0   ;;  %v2106_v1 = vmov 0.0   ;;  %v667_v2 = vld [vmem:[#allocation14] sm:$0xff] }
  0xee   : > { %1597 = vmatprep.subr.bf16.mxu1 %v2104_v0  ;;  %1573 = vmatprep.subr.bf16.mxu0 %v2104_v0  ;;  %v668_v3 = vld [vmem:[#allocation14 + $0x8] sm:$0xff]  ;;  %v566_v4 = vld [vmem:[#allocation12] sm:$0xff]  ;;  %v669_v7 = vld [vmem:[#allocation14 + $0x10] sm:$0xff]  ;;  %s2702_s8 = sld [smem:[#allocation35_spill]]  ;;  %vm661_vm1 = vcmask 7168   ;;  %vm925_vm2 = vcmask 64512  }
  0xef   : > { %1490 = vmatprep.mubr.msk.f32.mxu1 %vm2105_vm0, %v2106_v1  ;;  %1455 = vmatprep.mubr.msk.f32.mxu0 %vm2105_vm0, %v2106_v1  ;;  %v1598_v5 = vpack.c.bf16 %v668_v3, %v667_v2  ;;  %v567_v6 = vld [vmem:[#allocation12 + $0x8] sm:$0xff]  ;;  %v670_v8 = vld [vmem:[#allocation14 + $0x18] sm:$0xff]  ;;  %v568_v10 = vld [vmem:[#allocation12 + $0x10] sm:$0xff]  ;;  %663 = vst.msk [vmem:[#allocation4] sm:$0xff] %vm661_vm1, %v2106_v1  ;;  %s2703_s17 = sld [smem:[#allocation25_spill]]  ;;  %s2704_s30 = sld [smem:[#allocation29_spill]] }
  0xf0   : > { %v1574_v9 = vpack.c.bf16 %v567_v6, %v566_v4  ;;  %v569_v11 = vld [vmem:[#allocation12 + $0x18] sm:$0xff]  ;;  %v1601_v12 = vpack.c.bf16 %v670_v8, %v669_v7  ;;  %v671_v14 = vld [vmem:[#allocation14 + $0x20] sm:$0xff]  ;;  %v672_v15 = vld [vmem:[#allocation14 + $0x28] sm:$0xff]  ;;  %s2705_s29 = sld [smem:[#allocation36_spill]]  ;;  %s560_s13 = scalar_lea.vmem [#allocation18], %s2475_s10 }
  0xf1   : > { %1599 = vmatpush3.bf16.msra.mxu1 %v1598_v5  ;;  %v1577_v13 = vpack.c.bf16 %v569_v11, %v568_v10  ;;  %v570_v16 = vld [vmem:[#allocation12 + $0x20] sm:$0xff]  ;;  %v571_v17 = vld [vmem:[#allocation12 + $0x28] sm:$0xff]  ;;  %v1604_v18 = vpack.c.bf16 %v672_v15, %v671_v14  ;;  %v673_v20 = vld [vmem:[#allocation14 + $0x30] sm:$0xff]  ;;  %s1153_s1 = sshll.u32 %s560_s13, 4  ;;  %s2706_s24 = sld [smem:[#allocation37_spill]]  ;;  %s2577_s1 = int_to_ptr.vmem [resolvable:$true] %s1153_s1 }
  0xf2   : > { %1575 = vmatpush3.bf16.msra.mxu0 %v1574_v9  ;;  %1600 = vmatprep.subr.bf16.mxu1 %v2104_v0  ;;  %v1580_v19 = vpack.c.bf16 %v571_v17, %v570_v16  ;;  %v674_v21 = vld [vmem:[#allocation14 + $0x38] sm:$0xff]  ;;  %v572_v22 = vld [vmem:[#allocation12 + $0x30] sm:$0xff]  ;;  %v675_v26 = vld [vmem:[#allocation14 + $0x40] sm:$0xff]  ;;  %s2109_s10 = smov [#allocation18]  }
  0xf3   : > { %1576 = vmatprep.subr.bf16.mxu0 %v2104_v0  ;;  %v573_v23 = vld [vmem:[#allocation12 + $0x38] sm:$0xff]  ;;  %v1607_v24 = vpack.c.bf16 %v674_v21, %v673_v20  ;;  %v676_v27 = vld [vmem:[#allocation14 + $0x48] sm:$0xff]  ;;  %v574_v28 = vld [vmem:[#allocation12 + $0x40] sm:$0xff]  ;;  %s2003_s23 = sshll.u32 %s2109_s10, 4  ;;  %s2004_s23 = int_to_ptr.vmem [resolvable:$false] %s2003_s23 }
  0xf4   : > { %v1583_v25 = vpack.c.bf16 %v573_v23, %v572_v22  ;;  %v575_v29 = vld [vmem:[#allocation12 + $0x48] sm:$0xff]  ;;  %v1610_v30 = vpack.c.bf16 %v676_v27, %v675_v26  ;;  %v677_v32 = vld [vmem:[#allocation14 + $0x50] sm:$0xff]  ;;  %v678_v33 = vld [vmem:[#allocation14 + $0x58] sm:$0xff]  ;;  %s2005_s25 = scalar_lea.vmem %s2004_s23, 256  ;;  %p2006_p8 = scmp.lt.s32.totalorder %s2577_s1, %s2004_s23 }
  0xf5   : > { %1602 = vmatpush3.bf16.msra.mxu1 %v1601_v12  ;;  %v1586_v31 = vpack.c.bf16 %v575_v29, %v574_v28  ;;  %v576_v34 = vld [vmem:[#allocation12 + $0x50] sm:$0xff]  ;;  %v577_v35 = vld [vmem:[#allocation12 + $0x58] sm:$0xff]  ;;  %v1613_v36 = vpack.c.bf16 %v678_v33, %v677_v32  ;;  %v679_v38 = vld [vmem:[#allocation14 + $0x60] sm:$0xff]  ;;  %v2107_v28 = vmov -inf   ;;  %v2108_v32 = vmov 0   ;;  %s1348_s7 = sshll.u32 %s2703_s17, 7 }
  0xf6   : > { %1578 = vmatpush3.bf16.msra.mxu0 %v1577_v13  ;;  %1603 = vmatprep.subr.bf16.mxu1 %v2104_v0  ;;  %v1589_v37 = vpack.c.bf16 %v577_v35, %v576_v34  ;;  %v680_v39 = vld [vmem:[#allocation14 + $0x68] sm:$0xff]  ;;  %v578_v40 = vld [vmem:[#allocation12 + $0x60] sm:$0xff]  ;;  %v681_v44 = vld [vmem:[#allocation14 + $0x70] sm:$0xff]  ;;  %662 = vst.msk [vmem:[#allocation3] sm:$0xff] %vm661_vm1, %v2107_v28  ;;  %p2707_p2 = scmp.ne.s32.totalorder %s2704_s30, 0 }
  0xf7   : > { %1579 = vmatprep.subr.bf16.mxu0 %v2104_v0  ;;  %v579_v41 = vld [vmem:[#allocation12 + $0x68] sm:$0xff]  ;;  %v1616_v42 = vpack.c.bf16 %v680_v39, %v679_v38  ;;  %v682_v45 = vld [vmem:[#allocation14 + $0x78] sm:$0xff]  ;;  %v580_v46 = vld [vmem:[#allocation12 + $0x70] sm:$0xff]  ;;  %1789 = vset.pattern.permute.xlu0 %v2108_v32  ;;  %s2575_s12 = scalar_lea.hbm %s2706_s24, %s1348_s7 }
  0xf8   : > { %v1592_v43 = vpack.c.bf16 %v579_v41, %v578_v40  ;;  %v581_v47 = vld [vmem:[#allocation12 + $0x78] sm:$0xff]  ;;  %v1619_v48 = vpack.c.bf16 %v682_v45, %v681_v44  ;;  %v760_v50 = vld [vmem:[#allocation15] sm:$0xff]  ;;  %v761_v51 = vld [vmem:[#allocation15 + $0x8] sm:$0xff]  ;;  %1790 = vset.pattern.permute.xlu1 %v2108_v32 }
  0xf9   : > { %1605 = vmatpush3.bf16.msra.mxu1 %v1604_v18  ;;  %v1595_v49 = vpack.c.bf16 %v581_v47, %v580_v46  ;;  %v665_v52 = vld [vmem:[%s487_s15] sm:$0xff]  ;;  %v565_v53 = vld [vmem:[%s478_s27] sm:$0xff]  ;;  %v1622_v54 = vpack.c.bf16 %v761_v51, %v760_v50  ;;  %s1139_s15 = scalar_lea.sflag [#allocation8], %s2472_s21 }
  0xfa   : > { %1581 = vmatpush3.bf16.msra.mxu0 %v1580_v19  ;;  %1606 = vmatprep.subr.bf16.mxu1 %v2104_v0  ;;  %v762_v55 = vld [vmem:[#allocation15 + $0x10] sm:$0xff]  ;;  %v763_v56 = vld [vmem:[#allocation15 + $0x18] sm:$0xff]  ;;  %v764_v58 = vld [vmem:[#allocation15 + $0x20] sm:$0xff] }
  0xfb   : > { %1582 = vmatprep.subr.bf16.mxu0 %v2104_v0  ;;  %v1625_v57 = vpack.c.bf16 %v763_v56, %v762_v55  ;;  %v765_v59 = vld [vmem:[#allocation15 + $0x28] sm:$0xff]  ;;  %v766_v61 = vld [vmem:[#allocation15 + $0x30] sm:$0xff]  ;;  %v767_v62 = vld [vmem:[#allocation15 + $0x38] sm:$0xff] }
  0xfc   : > { %v1628_v60 = vpack.c.bf16 %v765_v59, %v764_v58  ;;  %v1631_v63 = vpack.c.bf16 %v767_v62, %v766_v61  ;;  %v768_v2 = vld [vmem:[#allocation15 + $0x40] sm:$0xff]  ;;  %v769_v3 = vld [vmem:[#allocation15 + $0x48] sm:$0xff]  ;;  %v770_v5 = vld [vmem:[#allocation15 + $0x50] sm:$0xff] }
  0xfd   : > { %1608 = vmatpush3.bf16.msra.mxu1 %v1607_v24  ;;  %v1634_v4 = vpack.c.bf16 %v769_v3, %v768_v2  ;;  %v771_v6 = vld [vmem:[#allocation15 + $0x58] sm:$0xff]  ;;  %v772_v8 = vld [vmem:[#allocation15 + $0x60] sm:$0xff]  ;;  %v773_v9 = vld [vmem:[#allocation15 + $0x68] sm:$0xff] }
  0xfe   : > { %1584 = vmatpush3.bf16.msra.mxu0 %v1583_v25  ;;  %1609 = vmatprep.subr.bf16.mxu1 %v2104_v0  ;;  %v1637_v7 = vpack.c.bf16 %v771_v6, %v770_v5  ;;  %v1640_v10 = vpack.c.bf16 %v773_v9, %v772_v8  ;;  %v774_v11 = vld [vmem:[#allocation15 + $0x70] sm:$0xff]  ;;  %v775_v12 = vld [vmem:[#allocation15 + $0x78] sm:$0xff]  ;;  %v1343_v15 = vld [vmem:[%s2630_s6] ss:$0 sm:$0xff] }
  0xff   : > { %1585 = vmatprep.subr.bf16.mxu0 %v2104_v0  ;;  %v1643_v13 = vpack.c.bf16 %v775_v12, %v774_v11  ;;  %v666_v14 = vld [vmem:[%s496_s22] sm:$0xff]  ;;  %v1342_v16 = vld [vmem:[%s2628_s4] ss:$0 sm:$0xff]  ;;  %v1045_v45 = vld [vmem:[#allocation17 + $0x8] sm:$0xff]  ;;  %s1999_s22 = scalar_lea.vmem %s2577_s1, 128 }
 0x100   : > { %v1344_v24 = vld [vmem:[%s2702_s8] ss:$0 sm:$0xff]  ;;  %v1046_v46 = vld [vmem:[#allocation17 + $0x10] sm:$0xff]  ;;  %v1049_v51 = vld [vmem:[#allocation17 + $0x28] sm:$0xff]  ;;  %p2000_p13 = scmp.ne.s32.totalorder %s2577_s1, %s1999_s22  ;;  %p2007_p9 = scmp.lt.s32.totalorder %s2005_s25, %s1999_s22 }
 0x101   : > { %1611 = vmatpush3.bf16.msra.mxu1 %v1610_v30  ;;  %v924_v33 = vld [vmem:[#allocation3] sm:$0xff]  ;;  %v1053_v56 = vld [vmem:[#allocation17 + $0x48] sm:$0xff]  ;;  %v1054_v58 = vld [vmem:[#allocation17 + $0x50] sm:$0xff] }
 0x102   : > { %1587 = vmatpush3.bf16.msra.mxu0 %v1586_v31  ;;  %1612 = vmatprep.subr.bf16.mxu1 %v2104_v0  ;;  %v1044_v44 = vld [vmem:[#allocation17] sm:$0xff]  ;;  %v1055_v59 = vld [vmem:[#allocation17 + $0x58] sm:$0xff]  ;;  %v1057_v62 = vld [vmem:[#allocation17 + $0x68] sm:$0xff]  ;;  %p2001_p1 = pnand %p2000_p13, %p2707_p2  ;;  %p2008_p7 = por %p2007_p9, %p2006_p8 }
 0x103   : > { %1588 = vmatprep.subr.bf16.mxu0 %v2104_v0  ;;  %v1646_v47 = vpack.c.bf16 %v1045_v45, %v1044_v44  ;;  %v1048_v50 = vld [vmem:[#allocation17 + $0x20] sm:$0xff]  ;;  %v1058_v2 = vld [vmem:[#allocation17 + $0x70] sm:$0xff]  ;;  %v1059_v3 = vld [vmem:[#allocation17 + $0x78] sm:$0xff] }
 0x104   : > { %v1052_v55 = vld [vmem:[#allocation17 + $0x40] sm:$0xff]  ;;  %v941_v5 = vld [vmem:[#allocation4] sm:$0xff]  ;;  %p2002_p12 = pneg %p2001_p1 }
 0x105   : > { %1614 = vmatpush3.bf16.msra.mxu1 %v1613_v36  ;;  %v1056_v61 = vld [vmem:[#allocation17 + $0x60] sm:$0xff] }
 0x106   : > { %1590 = vmatpush3.bf16.msra.mxu0 %v1589_v37  ;;  %1615 = vmatprep.subr.bf16.mxu1 %v2104_v0  ;;  %p2009_p11 = pnand %p2008_p7, %p2002_p12 }
 0x107   : > { %1591 = vmatprep.subr.bf16.mxu0 %v2104_v0 }
 0x109   : > { %1617 = vmatpush3.bf16.msra.mxu1 %v1616_v42 }
 0x10a   : > { %1593 = vmatpush3.bf16.msra.mxu0 %v1592_v43  ;;  %1618 = vmatprep.subr.bf16.mxu1 %v2104_v0 }
 0x10b   : > { %1594 = vmatprep.subr.bf16.mxu0 %v2104_v0 }
 0x10d   : > { %1620 = vmatpush3.bf16.msra.mxu1 %v1619_v48  ;;  %v1047_v48 = vld [vmem:[#allocation17 + $0x18] sm:$0xff] }
 0x10e   : > { %1596 = vmatpush3.bf16.msra.mxu0 %v1595_v49  ;;  %1533 = vmatprep.subr.mxu1 %v2106_v1  ;;  %v1649_v49 = vpack.c.bf16 %v1047_v48, %v1046_v46 }
 0x10f   : > { %1621 = vmatprep.subr.bf16.mxu0 %v2104_v0 }
 0x110   : > { %1491 = vmatmul.mubr.f32.vlgmr.msra.gmra.mrb[0].mxu1 %v665_v52  ;;  %v1652_v52 = vpack.c.bf16 %v1049_v51, %v1048_v50 }
 0x111   : > { %1456 = vmatmul.mubr.f32.vlgmr.msra.gmra.mrb[0].mxu0 %v565_v53  ;;  %1535 = vmatprep.mubr.msk.f32.mxu1 %vm2105_vm0, %v2106_v1  ;;  %v1051_v53 = vld [vmem:[#allocation17 + $0x38] sm:$0xff] }
 0x112   : > { %1623 = vmatpush3.bf16.msra.mxu0 %v1622_v54  ;;  %1525 = vmatprep.mubr.msk.f32.mxu0 %vm2105_vm0, %v2106_v1 }
 0x113   : > { %1624 = vmatprep.subr.bf16.mxu0 %v2104_v0 }
 0x116   : > { %1626 = vmatpush3.bf16.msra.mxu0 %v1625_v57  ;;  %v1658_v57 = vpack.c.bf16 %v1053_v56, %v1052_v55 }
 0x117   : > { %1627 = vmatprep.subr.bf16.mxu0 %v2104_v0 }
 0x11a   : > { %1629 = vmatpush3.bf16.msra.mxu0 %v1628_v60  ;;  %v1661_v60 = vpack.c.bf16 %v1055_v59, %v1054_v58 }
 0x11b   : > { %1630 = vmatprep.subr.bf16.mxu0 %v2104_v0 }
 0x11e   : > { %1632 = vmatpush3.bf16.msra.mxu0 %v1631_v63  ;;  %v1664_v63 = vpack.c.bf16 %v1057_v62, %v1056_v61 }
 0x11f   : > { %1633 = vmatprep.subr.bf16.mxu0 %v2104_v0 }
 0x122   : > { %1635 = vmatpush3.bf16.msra.mxu0 %v1634_v4  ;;  %v1667_v4 = vpack.c.bf16 %v1059_v3, %v1058_v2 }
 0x123   : > { %1636 = vmatprep.subr.bf16.mxu0 %v2104_v0 }
 0x126   : > { %1638 = vmatpush3.bf16.msra.mxu0 %v1637_v7 }
 0x127   : > { %1639 = vmatprep.subr.bf16.mxu0 %v2104_v0 }
 0x12a   : > { %1641 = vmatpush3.bf16.msra.mxu0 %v1640_v10 }
 0x12b   : > { %1642 = vmatprep.subr.bf16.mxu0 %v2104_v0 }
 0x12e   : > { %1644 = vmatpush3.bf16.msra.mxu0 %v1643_v13 }
 0x12f   : > { %1528 = vmatprep.subr.mxu0 %v2106_v1 }
 0x131   : > { %1526 = vmatmul.mubr.f32.vlgmr.msra.gmra.mrb[2].mxu0 %v666_v14 }
 0x132   : > { %1530 = vmatprep.mubr.msk.f32.mxu0 %vm2105_vm0, %v2106_v1 }
 0x1e3   : > { %v756_v17 = vpop.f32.mrb[0].mxu1 }
 0x1e4   : > { %v757_v18 = vadd.f32 %v1343_v15, %v756_v17  ;;  %v655_v19 = vpop.f32.mrb[0].mxu0  ;;  %v1492_v20 = vpop.f32.mrb[1].mxu1  ;;  %v1346_v17 = vld [vmem:[%s2705_s29] ss:$0 sm:$0xff] }
 0x1e5   : > { %v656_v21 = vadd.f32 %v1342_v16, %v655_v19  ;;  %v1457_v22 = vpop.f32.mrb[1].mxu0 }
 0x1e6   : > { %1529 = vmatpush3.xpose.msra.mxu0 %v757_v18 }
 0x1e7   : > { %v659_v23 = vmul.f32 0.17677669, %v656_v21 }
 0x1e9   : > { %1531 = vmatmul.mubr.f32.vlgmr.msra.gmra.mrb[4].mxu0 %v659_v23 }
 0x204   : > { %v849_v25 = vpop.f32.mrb[2].mxu0 }
 0x205   : > { %v850_v26 = vadd.f32 %v1344_v24, %v849_v25  ;;  %v1527_v27 = vpop.f32.mrb[3].mxu0 }
 0x207   : > { %1534 = vmatpush3.msra.mxu1 %v850_v26 }
 0x208   : > { %1645 = vmatprep.subr.bf16.mxu1 %v2104_v0 }
 0x2bc   : > { %v920_v29 = vpop.f32.mrb[4].mxu0 }
 0x2bd   : > { %v1532_v30 = vpop.f32.mrb[5].mxu0  ;;  %v926_v31 = vsel %vm925_vm2, %v920_v29, -inf }
 0x2be   : > { %927 = vmax.xlane.f32.xlu0 %v926_v31 }
 0x34b   : > { %v928_v34 = vpop.xlane.xlu0 %927 }
 0x34c   : > { %v929_v35 = vmax.f32 %v924_v33, %v928_v34 }
 0x34e   : > { %v930_v36 = vsub.f32 %v924_v33, %v929_v35  ;;  %1031 = vst.msk [vmem:[#allocation3] sm:$0xff] %vm661_vm1, %v929_v35  ;;  %935 = vperm.xlu0 %1789, %v929_v35  }
 0x350   : > { %v931_v42 = vmul.f32 1.442695, %v930_v36 }
 0x3cd   : > { %v936_v37 = vpop.permute.xlu0 %935 }
 0x3ce   : > { %v938_v38 = vsub.f32 %v920_v29, %v936_v37 }
 0x3d0   : > { %v939_v39 = vmul.f32 1.442695, %v938_v38 }
 0x3d2   : > { %1791 = vpow2.f32 %v939_v39 }
 0x3d3   : > { %1793 = vpow2.f32 %v931_v42 }
 0x3dc   : > { %v1792_v40 = vpop.eup %1791 }
 0x3dd   : > { %1536 = vmatmul.mubr.msk.f32.vlgmr.msra.gmra.mrb[2].mxu1 %vm925_vm2, %v1792_v40  ;;  %v943_v41 = vsel %vm925_vm2, %v1792_v40, 0.0  ;;  %v1794_v43 = vpop.eup %1793 }
 0x3de   : > { %944 = vadd.xlane.f32.xlu1 %v943_v41  ;;  %1570 = vmatprep.mubr.msk.f32.mxu1 %vm2105_vm0, %v2106_v1  ;;  %v1050_v1 = vld [vmem:[#allocation17 + $0x30] sm:$0xff]  ;;  %v942_v6 = vmul.f32 %v1794_v43, %v941_v5 }
 0x3df   : > { %1647 = vmatpush3.bf16.msra.mxu1 %v1646_v47  ;;  %v1655_v54 = vpack.c.bf16 %v1051_v53, %v1050_v1 }
 0x3e0   : > { %1648 = vmatprep.subr.bf16.mxu1 %v2104_v0 }
 0x3e3   : > { %1650 = vmatpush3.bf16.msra.mxu1 %v1649_v49 }
 0x3e4   : > { %1651 = vmatprep.subr.bf16.mxu1 %v2104_v0 }
 0x3e7   : > { %1653 = vmatpush3.bf16.msra.mxu1 %v1652_v52 }
 0x3e8   : > { %1654 = vmatprep.subr.bf16.mxu1 %v2104_v0 }
 0x3eb   : > { %1656 = vmatpush3.bf16.msra.mxu1 %v1655_v54 }
 0x3ec   : > { %1657 = vmatprep.subr.bf16.mxu1 %v2104_v0 }
 0x3ef   : > { %1025 = vperm.xlu1 %1790, %v1794_v43   ;;  %1659 = vmatpush3.bf16.msra.mxu1 %v1658_v57 }
 0x3f0   : > { %1660 = vmatprep.subr.bf16.mxu1 %v2104_v0 }
 0x3f3   : > { %1662 = vmatpush3.bf16.msra.mxu1 %v1661_v60 }
 0x3f4   : > { %1663 = vmatprep.subr.bf16.mxu1 %v2104_v0 }
 0x3f7   : > { %1665 = vmatpush3.bf16.msra.mxu1 %v1664_v63 }
 0x3f8   : > { %1666 = vmatprep.subr.bf16.mxu1 %v2104_v0 }
 0x3fb   : > { %1668 = vmatpush3.bf16.msra.mxu1 %v1667_v4 }
 0x46b   : > { %v945_v7 = vpop.xlane.xlu1 %944 }
 0x46c   : > { %v946_v8 = vadd.f32 %v945_v7, %v942_v6 }
 0x46e   : > { %948 = vst.msk [vmem:[#allocation4] sm:$0xff] %vm661_vm1, %v946_v8 }
 0x46f   : > { %v1026_v13 = vpop.permute.xlu1 %1025 }
 0x470   : > { %v1028_v14 = vmul.f32 0.0, %v1026_v13 }
 0x475   : > { %v1035_v9 = vld [vmem:[#allocation4] sm:$0xff] }
 0x476   : > { %1795 = vrcp.f32 %v1035_v9 }
 0x480   : > { %v1796_v10 = vpop.eup %1795 }
 0x481   : > { %1040 = vperm.xlu1 %1790, %v1796_v10  }
 0x4b0   : > { %v1018_v11 = vpop.f32.mrb[2].mxu1 }
 0x4b1   : > { %v1537_v12 = vpop.f32.mrb[3].mxu1  ;;  %v1029_v15 = vadd.f32 %v1028_v14, %v1018_v11 }
 0x500   : > { %v1041_v0 = vpop.permute.xlu1 %1040 }
 0x501   : > { %v1043_v16 = vmul.f32 %v1041_v0, %v1029_v15 }
 0x503   : > { %1571 = vmatmul.mubr.f32.vlgmr.msra.gmra.mrb[4].mxu1 %v1043_v16 }
 0x5d6   : > { %v1133_v18 = vpop.f32.mrb[4].mxu1 }
 0x5d7   : > { %v1134_v19 = vadd.f32 %v1346_v17, %v1133_v18  ;;  %v1572_v20 = vpop.f32.mrb[5].mxu1 }
 0x5d9   : > { %1137 = vst [vmem:[%s560_s13] sm:$0xff] %v1134_v19 }
 0x5da   : > { %2012 = shalt.err (!%p2009_p11)
}
 0x5db   : > { %s2013_s21 = scalar_lea.hbm %s2575_s12, 128  ;;  %s2017_s3 = scalar_lea.hbm %s2706_s24, 256 }
 0x5dc   : > { %p2014_p5 = scmp.ne.s32.totalorder %s2575_s12, %s2013_s21  ;;  %p2018_p0 = scmp.lt.u32.totalorder %s2575_s12, %s2706_s24 }
 0x5dd   : > { %p2019_p4 = scmp.lt.u32.totalorder %s2017_s3, %s2013_s21  ;;  %p2021_p13 = scmp.lt.u32.totalorder %s2013_s21, %s2575_s12 }
 0x5de   : > { %p2015_p3 = pnand %p2014_p5, %p2707_p2 }
 0x5df   : > { %p2020_p10 = por %p2019_p4, %p2018_p0 }
 0x5e0   : > { %p2016_p6 = pneg %p2015_p3 }
 0x5e1   : > { %p2022_p1 = por %p2021_p13, %p2020_p10 }
 0x5e3   : > { %p2023_p12 = pnand %p2022_p1, %p2016_p6 }
 0x5e5   : > { %2026 = shalt.err (!%p2023_p12)
}
 0x5e6   : > { %1691 = dma.vmem_to_hbm [thread:$0]  (%p2707_p2), %s2577_s1, 128, %s2575_s12, %s1139_s15  }
 0x5e7 PF: > { %s2708_s17 = sld [smem:[#allocation24_spill]]  ;;  %s2709_s28 = sld [smem:[#allocation31_spill]] }
 0x5e8   : > { %s2710_s16 = sld [smem:[#allocation27_spill]] }
 0x5ed   : > { %s1165_s29 = sand.u32 1, %s2708_s17   ;;  %p2711_p8 = scmp.ne.s32.totalorder %s2709_s28, 0 }
 0x5ee   : > { %p2712_p9 = scmp.ge.s32.totalorder %s2710_s16, 2  ;;  %s1166_s7 = scalar_lea.sflag [#allocation8], %s1165_s29 }
 0x5f0   : > { %p1717_p7 = pnand %p2712_p9, %p2711_p8 }
 0x5f2   : > { %2068 = dma.done.wait (!%p1717_p7), %s1166_s7, 128  }
 0x5f3   : > { %2070 = vsyncadd (!%p1717_p7), %s1166_s7, 4294967168  ;;  %s32_s22 = sadd.s32 1, %s2710_s16   ;;  %s2713_s30 = sld [smem:[#allocation30_spill]] }
 0x5f4   : > { %p29_p11 = scmp.ge.s32.totalorder %s32_s22, 4   ;;  %s2714_s20 = sld [smem:[#allocation26_spill]] }
 0x5f5   : > { %s2715_s21 = sld [smem:[#allocation28_spill]]  ;;  %s2716_s17 = smov %s2077_s18 }
 0x5f6   : > { %s2717_s18 = smov %s2081_s19  ;;  %31 = sbr.rel (!%p29_p11) target bundleno = 17 (0x11), region = 157 }
 0x5f9   : > { %s2718_s19 = smov %s2713_s30 }
 0x5fd   :  { %1171 = vsyncpa [#allocation7], 1 }
 0x5fe   :  { %1173 = vsyncpa [#allocation7 + $0x1], 1 }
 0x5ff   :  { %1174 = vsyncpa [#allocation10], 1 }
 0x600   :  { %1176 = vsyncpa [#allocation10 + $0x1], 1 }
 0x601   :  { %1177 = vsyncpa [#allocation13], 1 }
 0x602   :  { %1178 = vsyncpa [#allocation16], 1 }
 0x603   :  { %1179 = vsyncpa [#allocation8], 1 }
 0x604   :  { %1181 = vsyncpa [#allocation8 + $0x1], 1 }

</bundles_post_ra>
